<compile_context>
chip_gen: v7x
topology: tpu7x:2x2x1
jax: 0.10.0
libtpu: 0.0.40
codegen_flags: <defaults>
</compile_context>

<pallas_src>
import math

import jax
import jax.numpy as jnp
from jax import lax
from jax.experimental import pallas as pl
from jax.experimental.pallas import tpu as pltpu

# TODO(synk): SISO_Channel is not available here; len(env.state) assumed = 12
# (real+imag per user for K=6).  A mismatch would change the model silently.
INPUT_DIM = 12
HIDDEN = 128
BLOCK_M = 256   # batch rows per grid step (multiple of 16 for bf16 sublane packing)


def actor_kernel(x_ref, w1_ref, w2_ref, wh_ref, b12_ref, bh_ref, out_ref):
    x = x_ref[...]                                   # (BM, F) bf16

    # Packed bias slab: [b1 | b2], static 128-aligned slices.
    b1 = b12_ref[:, 0:HIDDEN]                        # (1, 128) f32
    b2 = b12_ref[:, HIDDEN:2 * HIDDEN]               # (1, 128) f32

    # fc1 + ReLU (bf16 operands into the MXU, f32 accumulate)
    h1 = jnp.dot(x, w1_ref[...], preferred_element_type=jnp.float32) + b1
    h1 = jnp.maximum(h1, 0.0)

    # fc2 + ReLU
    h2 = jnp.dot(h1.astype(jnp.bfloat16), w2_ref[...],
                 preferred_element_type=jnp.float32) + b2
    h2 = jnp.maximum(h2, 0.0)

    # Fused heads, lane-dense: w_head is (2, H); contract both last dims
    # (A @ B.T pattern) -> head is (2, BM), so the output last dim is the batch
    # block (unmasked full-lane stores).
    head = lax.dot_general(
        wh_ref[...], h2.astype(jnp.bfloat16),
        dimension_numbers=(((1,), (1,)), ((), ())),
        preferred_element_type=jnp.float32) + bh_ref[...]          # (2, BM)

    # Row 0 = mu -> tanh, row 1 = sigma -> softplus (stable form).
    # The redundant transcendental on the other row rides the EUP slot (slack).
    tanh_v = jnp.tanh(head)
    softplus_v = jnp.maximum(head, 0.0) + jnp.log1p(jnp.exp(-jnp.abs(head)))
    row = lax.broadcasted_iota(jnp.int32, head.shape, 0)
    out_ref[...] = jnp.where(row == 0, tanh_v, softplus_v)


def actor_forward(x, params, *, block_m=BLOCK_M):
    """x: (B, INPUT_DIM). Returns fused f32 (2, B): row 0 = mu, row 1 = sigma."""
    B, F = x.shape
    b_pad = pl.cdiv(B, block_m) * block_m
    x_bf = x.astype(jnp.bfloat16)
    if b_pad != B:
        x_bf = jnp.pad(x_bf, ((0, b_pad - B), (0, 0)))

    flops = 2 * b_pad * (F * HIDDEN + HIDDEN * HIDDEN + HIDDEN * 2)
    bytes_accessed = (
        b_pad * F * 2                                         # x (bf16)
        + (F * HIDDEN + HIDDEN * HIDDEN + 2 * HIDDEN) * 2     # weights (bf16)
        + (2 * HIDDEN + 2) * 4                                # biases (f32)
        + 2 * b_pad * 4                                       # output (f32)
    )

    out = pl.pallas_call(
        actor_kernel,
        out_shape=jax.ShapeDtypeStruct((2, b_pad), jnp.float32),
        grid=(b_pad // block_m,),
        in_specs=[
            pl.BlockSpec((block_m, F), lambda i: (i, 0)),        # x: tiled over batch
            pl.BlockSpec((F, HIDDEN), lambda i: (0, 0)),         # w1: VMEM-resident
            pl.BlockSpec((HIDDEN, HIDDEN), lambda i: (0, 0)),    # w2: VMEM-resident
            pl.BlockSpec((2, HIDDEN), lambda i: (0, 0)),         # w_head: resident
            pl.BlockSpec((1, 2 * HIDDEN), lambda i: (0, 0)),     # packed [b1|b2]
            pl.BlockSpec((2, 1), lambda i: (0, 0)),              # head bias (2,1)
        ],
        out_specs=pl.BlockSpec((2, block_m), lambda i: (0, i)),
        compiler_params=pltpu.CompilerParams(
            dimension_semantics=("parallel",)),
        cost_estimate=pl.CostEstimate(
            flops=flops, transcendentals=6 * b_pad, bytes_accessed=bytes_accessed),
    )(x_bf, params["w1"], params["w2"], params["w_head"],
      params["b12"], params["b_head"])

    return out[:, :B] if b_pad != B else out


def init_params(key, input_dim=INPUT_DIM, hidden=HIDDEN):
    """PyTorch nn.Linear default init: U(-1/sqrt(fan_in), 1/sqrt(fan_in))."""
    keys = jax.random.split(key, 8)

    def linear(kw, kb, fan_in, fan_out):
        bound = 1.0 / math.sqrt(fan_in)
        w = jax.random.uniform(kw, (fan_in, fan_out), jnp.float32, -bound, bound)
        b = jax.random.uniform(kb, (fan_out,), jnp.float32, -bound, bound)
        return w, b

    w1, b1 = linear(keys[0], keys[1], input_dim, hidden)
    w2, b2 = linear(keys[2], keys[3], hidden, hidden)
    w_mu, b_mu = linear(keys[4], keys[5], hidden, 1)
    w_sigma, b_sigma = linear(keys[6], keys[7], hidden, 1)

    w_head = jnp.concatenate([w_mu, w_sigma], axis=1).T           # (2, hidden)
    b_head = jnp.stack([b_mu, b_sigma], axis=0).reshape(2, 1)     # (2, 1)
    b12 = jnp.concatenate([b1, b2], axis=0).reshape(1, 2 * hidden)

    return dict(
        w1=w1.astype(jnp.bfloat16),
        w2=w2.astype(jnp.bfloat16),
        w_head=w_head.astype(jnp.bfloat16),
        b12=b12,            # f32
        b_head=b_head,      # f32
    )


def reference_forward(x, p):
    """Pure-JAX reference mirroring the kernel's bf16 rounding points."""
    f32 = jnp.float32
    hp = lax.Precision.HIGHEST
    xb = x.astype(jnp.bfloat16).astype(f32)
    w1 = p["w1"].astype(f32)
    w2 = p["w2"].astype(f32)
    wh = p["w_head"].astype(f32)
    b1 = p["b12"][:, :HIDDEN]
    b2 = p["b12"][:, HIDDEN:]

    h1 = jnp.maximum(jnp.dot(xb, w1, precision=hp) + b1, 0.0)
    h1 = h1.astype(jnp.bfloat16).astype(f32)
    h2 = jnp.maximum(jnp.dot(h1, w2, precision=hp) + b2, 0.0)
    h2 = h2.astype(jnp.bfloat16).astype(f32)

    head = jnp.dot(h2, wh.T, precision=hp) + p["b_head"].T        # (B, 2)
    mu = jnp.tanh(head[:, 0])
    sigma = jnp.maximum(head[:, 1], 0.0) + jnp.log1p(jnp.exp(-jnp.abs(head[:, 1])))
    return mu, sigma


if __name__ == "__main__":
    key = jax.random.PRNGKey(0)
    k_x, k_p = jax.random.split(key)

    B = 1024  # many actor evaluations batched into one call (4 grid steps of 256)
    x = jax.random.normal(k_x, (B, INPUT_DIM), jnp.float32)
    params = init_params(k_p)

    out = jax.block_until_ready(actor_forward(x, params))   # fused (2, B)
    assert out.shape == (2, B)
    mu, sigma = out[0], out[1]

    mu_ref, sigma_ref = reference_forward(x, params)
    # Tolerance covers MXU-vs-XLA f32 accumulation-order differences hitting
    # occasional bf16 rounding knife-edges in the intermediate activations.
    assert jnp.allclose(mu, mu_ref, atol=5e-3, rtol=5e-3)
    assert jnp.allclose(sigma, sigma_ref, atol=5e-3, rtol=5e-3)

    print("KERNEL_OK")
</pallas_src>

<mosaic_0001>
module attributes {stable_mosaic.version = 11 : i64} {
  func.func @actor_kernel(%arg0: i32, %arg1: memref<256x12xbf16, #tpu.memory_space<vmem>>, %arg2: memref<12x128xbf16, #tpu.memory_space<vmem>>, %arg3: memref<128x128xbf16, #tpu.memory_space<vmem>>, %arg4: memref<2x128xbf16, #tpu.memory_space<vmem>>, %arg5: memref<1x256xf32, #tpu.memory_space<vmem>>, %arg6: memref<2x1xf32, #tpu.memory_space<vmem>>, %arg7: memref<2x256xf32, #tpu.memory_space<vmem>>) attributes {dimension_semantics = [#tpu.dimension_semantics<parallel>], iteration_bounds = array<i64: 4>, scalar_prefetch = 0 : i64, scratch_operands = 0 : i64, tpu.core_type = #tpu.core_type<tc>, window_params = [{transform_indices = @transform_0, window_bounds = array<i64: 256, 12>}, {pipeline_mode = #tpu.pipeline_mode<synchronous>, transform_indices = @transform_1, window_bounds = array<i64: 12, 128>}, {pipeline_mode = #tpu.pipeline_mode<synchronous>, transform_indices = @transform_2, window_bounds = array<i64: 128, 128>}, {pipeline_mode = #tpu.pipeline_mode<synchronous>, transform_indices = @transform_3, window_bounds = array<i64: 2, 128>}, {pipeline_mode = #tpu.pipeline_mode<synchronous>, transform_indices = @transform_4, window_bounds = array<i64: 1, 256>}, {pipeline_mode = #tpu.pipeline_mode<synchronous>, transform_indices = @transform_5, window_bounds = array<i64: 2, 1>}, {transform_indices = @transform_6, window_bounds = array<i64: 2, 256>}]} {
    %c0 = arith.constant 0 : index
    %c0_0 = arith.constant 0 : index
    %0 = vector.load %arg1[%c0, %c0_0] : memref<256x12xbf16, #tpu.memory_space<vmem>>, vector<256x12xbf16>
    %c0_1 = arith.constant 0 : index
    %c0_2 = arith.constant 0 : index
    %1 = vector.load %arg5[%c0_1, %c0_2] : memref<1x256xf32, #tpu.memory_space<vmem>>, vector<1x128xf32>
    %c0_3 = arith.constant 0 : index
    %c128 = arith.constant 128 : index
    %2 = vector.load %arg5[%c0_3, %c128] : memref<1x256xf32, #tpu.memory_space<vmem>>, vector<1x128xf32>
    %c0_4 = arith.constant 0 : index
    %c0_5 = arith.constant 0 : index
    %3 = vector.load %arg2[%c0_4, %c0_5] : memref<12x128xbf16, #tpu.memory_space<vmem>>, vector<12x128xbf16>
    %cst = arith.constant dense<0.000000e+00> : vector<256x128xf32>
    %4 = tpu.matmul %0, %3, %cst {dimension_numbers = #tpu.dot_dimension_numbers<[1], [0], [0], [1], [0, 0, 1, 1], [], []>} : vector<256x12xbf16>, vector<12x128xbf16>, vector<256x128xf32> -> vector<256x128xf32>
    %5 = vector.broadcast %1 : vector<1x128xf32> to vector<256x128xf32>
    %6 = arith.addf %4, %5 : vector<256x128xf32>
    %cst_6 = arith.constant 0.000000e+00 : f32
    %7 = vector.broadcast %cst_6 : f32 to vector<256x128xf32>
    %8 = arith.maximumf %6, %7 : vector<256x128xf32>
    %9 = arith.truncf %8 : vector<256x128xf32> to vector<256x128xbf16>
    %c0_7 = arith.constant 0 : index
    %c0_8 = arith.constant 0 : index
    %10 = vector.load %arg3[%c0_7, %c0_8] : memref<128x128xbf16, #tpu.memory_space<vmem>>, vector<128x128xbf16>
    %cst_9 = arith.constant dense<0.000000e+00> : vector<256x128xf32>
    %11 = tpu.matmul %9, %10, %cst_9 {dimension_numbers = #tpu.dot_dimension_numbers<[1], [0], [0], [1], [0, 0, 1, 1], [], []>} : vector<256x128xbf16>, vector<128x128xbf16>, vector<256x128xf32> -> vector<256x128xf32>
    %12 = vector.broadcast %2 : vector<1x128xf32> to vector<256x128xf32>
    %13 = arith.addf %11, %12 : vector<256x128xf32>
    %cst_10 = arith.constant 0.000000e+00 : f32
    %14 = vector.broadcast %cst_10 : f32 to vector<256x128xf32>
    %15 = arith.maximumf %13, %14 : vector<256x128xf32>
    %c0_11 = arith.constant 0 : index
    %c0_12 = arith.constant 0 : index
    %16 = vector.load %arg4[%c0_11, %c0_12] : memref<2x128xbf16, #tpu.memory_space<vmem>>, vector<2x128xbf16>
    %17 = arith.truncf %15 : vector<256x128xf32> to vector<256x128xbf16>
    %cst_13 = arith.constant dense<0.000000e+00> : vector<2x256xf32>
    %18 = tpu.matmul %16, %17, %cst_13 {dimension_numbers = #tpu.dot_dimension_numbers<[1], [1], [0], [0], [0, 0, 1, 0], [], []>} : vector<2x128xbf16>, vector<256x128xbf16>, vector<2x256xf32> -> vector<2x256xf32>
    %c0_14 = arith.constant 0 : index
    %c0_15 = arith.constant 0 : index
    %19 = vector.load %arg6[%c0_14, %c0_15] : memref<2x1xf32, #tpu.memory_space<vmem>>, vector<2x1xf32>
    %20 = vector.broadcast %19 : vector<2x1xf32> to vector<2x256xf32>
    %21 = arith.addf %18, %20 : vector<2x256xf32>
    %22 = math.tanh %21 : vector<2x256xf32>
    %cst_16 = arith.constant 0.000000e+00 : f32
    %23 = vector.broadcast %cst_16 : f32 to vector<2x256xf32>
    %24 = arith.maximumf %21, %23 : vector<2x256xf32>
    %25 = math.absf %21 : vector<2x256xf32>
    %cst_17 = arith.constant 0.000000e+00 : f32
    %26 = vector.broadcast %cst_17 : f32 to vector<2x256xf32>
    %27 = arith.subf %26, %25 : vector<2x256xf32>
    %28 = math.exp %27 : vector<2x256xf32>
    %29 = math.log1p %28 : vector<2x256xf32>
    %30 = arith.addf %24, %29 : vector<2x256xf32>
    %31 = tpu.iota {dimensions = array<i32: 0>} : vector<2x256xi32>
    %c0_i32 = arith.constant 0 : i32
    %32 = vector.broadcast %c0_i32 : i32 to vector<2x256xi32>
    %33 = arith.cmpi eq, %31, %32 : vector<2x256xi32>
    %34 = arith.select %33, %22, %30 : vector<2x256xi1>, vector<2x256xf32>
    %c0_18 = arith.constant 0 : index
    %c0_19 = arith.constant 0 : index
    %35 = vector.load %arg7[%c0_18, %c0_19] : memref<2x256xf32, #tpu.memory_space<vmem>>, vector<2x256xf32>
    tpu.vector_store %arg7[%c0_18, %c0_19], %34 {strides = array<i32>} : memref<2x256xf32, #tpu.memory_space<vmem>>, vector<2x256xf32>,
    return
  }
  func.func @transform_0(%arg0: i32) -> (i32, i32) {
    %c0_i32 = arith.constant 0 : i32
    %c0_i32_0 = arith.constant 0 : i32
    return %arg0, %c0_i32 : i32, i32
  }
  func.func @transform_1(%arg0: i32) -> (i32, i32) {
    %c0_i32 = arith.constant 0 : i32
    %c0_i32_0 = arith.constant 0 : i32
    %c0_i32_1 = arith.constant 0 : i32
    return %c0_i32, %c0_i32_0 : i32, i32
  }
  func.func @transform_2(%arg0: i32) -> (i32, i32) {
    %c0_i32 = arith.constant 0 : i32
    %c0_i32_0 = arith.constant 0 : i32
    %c0_i32_1 = arith.constant 0 : i32
    return %c0_i32, %c0_i32_0 : i32, i32
  }
  func.func @transform_3(%arg0: i32) -> (i32, i32) {
    %c0_i32 = arith.constant 0 : i32
    %c0_i32_0 = arith.constant 0 : i32
    %c0_i32_1 = arith.constant 0 : i32
    return %c0_i32, %c0_i32_0 : i32, i32
  }
  func.func @transform_4(%arg0: i32) -> (i32, i32) {
    %c0_i32 = arith.constant 0 : i32
    %c0_i32_0 = arith.constant 0 : i32
    %c0_i32_1 = arith.constant 0 : i32
    return %c0_i32, %c0_i32_0 : i32, i32
  }
  func.func @transform_5(%arg0: i32) -> (i32, i32) {
    %c0_i32 = arith.constant 0 : i32
    %c0_i32_0 = arith.constant 0 : i32
    %c0_i32_1 = arith.constant 0 : i32
    return %c0_i32, %c0_i32_0 : i32, i32
  }
  func.func @transform_6(%arg0: i32) -> (i32, i32) {
    %c0_i32 = arith.constant 0 : i32
    %c0_i32_0 = arith.constant 0 : i32
    return %c0_i32, %arg0 : i32, i32
  }
}

</mosaic_0001>

<bundles_post_ra>
// kernel: tpu_custom_call.1
= control target key start
LH: loop header
LB: loop body
LE: loop exit
PB: predicated region body
PF: predicated region fallthrough
CT: control target
= control target key end

     0   :  { %11 = vsyncpa [#allocation3], 0  ;;  %s1743_s0 = inlined_call_operand.vmem [shape: bf16[1024,12], index: 0, kind: input, shape index: {}]   ;;  %s1744_s1 = inlined_call_operand.vmem [shape: bf16[12,128], index: 1, kind: input, shape index: {}]   ;;  %s1745_s2 = inlined_call_operand.vmem [shape: bf16[128,128], index: 2, kind: input, shape index: {}]   ;;  %s1746_s3 = inlined_call_operand.vmem [shape: bf16[2,128], index: 3, kind: input, shape index: {}]   ;;  %s1747_s4 = inlined_call_operand.vmem [shape: f32[1,256], index: 4, kind: input, shape index: {}]   ;;  %s1748_s5 = inlined_call_operand.vmem [shape: f32[2,1], index: 5, kind: input, shape index: {}]   ;;  %s1749_s6 = inlined_call_operand.hbm [shape: f32[2,1024], index: 6, kind: output, shape index: {}]  }
   0x1   :  { %13 = vsyncpa [#allocation3 + $0x1], 0  ;;  %s1471_s21 = smov 0   ;;  %s1473_s22 = smov 0  }
   0x2   :  { %s1475_s23 = smov 0   ;;  %s1477_s24 = smov 0  }
   0x3 LB: > { %s1492_s25 = sadd.s32 4294967295, %s1432_s24   ;;  %s1093_s26 = sadd.s32 4294967294, %s1432_s24   ;;  %s1432_s24 = sphi %s1477_s24, %s1755_s24   ;;  %s1428_s23 = sphi %s1475_s23, %s1754_s23   ;;  %s1424_s22 = sphi %s1473_s22, %s1753_s22   ;;  %s1420_s21 = sphi %s1471_s21, %s1752_s21  }
   0x4   : > { %s1496_s27 = sadd.s32 1, %s1432_s24   ;;  %s157_s28 = sadd.s32 1, %s1428_s23 }
   0x5   : > { %s154_s29 = ssub.s32 %s1432_s24, %s1496_s27  ;;  %p167_p0 = scmp.ne.s32.totalorder %s1428_s23, %s1424_s22 }
   0x6   : > { %p155_p1 = scmp.eq.s32.totalorder %s154_s29, 0  ;;  %p168_p2 = scmp.eq.s32.totalorder %s1492_s25, 3 }
   0x7   : > { %p173_p3 = scmp.ne.s32.totalorder %s1424_s22, %s1420_s21  ;;  %p174_p4 = scmp.eq.s32.totalorder %s1093_s26, 3 }
   0x8   : > { %s1507_s30 = scalar_select %p155_p1, %s1428_s23, %s157_s28  }
   0x9   : > { %p1509_p5 = por %p168_p2, %p167_p0  ;;  %p1513_p6 = por %p174_p4, %p173_p3 }
   0xa   : > { %p1096_p7 = scmp.ge.s32.totalorder %s1432_s24, 1  ;;  %p216_p8 = scmp.lt.s32.totalorder %s1432_s24, 5 }
   0xc   : > { %p217_p9 = pnand %p1096_p7, %p216_p8 }
   0xd   : > { %v1333_v0 = vld [vmem:[%s1744_s1] sm:$0x3f] (!%p217_p9)   ;;  %vm430_vm0 = vcmask (!%p217_p9), 1045504   ;;  %s1098_s11 = sshll.u32 (!%p217_p9), %s1492_s25, 5  ;;  %v1351_v3 = vld [vmem:[%s1745_s2 + $0x8] sm:$0xff] (!%p217_p9)   ;;  %v1352_v4 = vld [vmem:[%s1745_s2 + $0x10] sm:$0xff] (!%p217_p9)  }
   0xe   : > { %220 = sbr.rel (%p217_p9) target bundleno = 832 (0x340), region = 44  ;;  %v1350_v1 = vld [vmem:[%s1745_s2] sm:$0xff] (!%p217_p9)   ;;  %1291 = vmatprep.subr.msk.bf16.mxu0 (!%p217_p9), %vm430_vm0, %v1333_v0  ;;  %v432_v2 = vsel (!%p217_p9), %vm430_vm0, %v1333_v0, 0  ;;  %p247_p10 = scmp.lt.s32.totalorder (!%p217_p9), %s1098_s11, 127  ;;  %vm381_vm1 = vcmask (!%p217_p9), 97280   ;;  %v1353_v5 = vld [vmem:[%s1745_s2 + $0x18] sm:$0xff] (!%p217_p9)  }
   0xf   : > { %1210 = vmatpush3.bf16.msra.mxu0 (!%p217_p9), %v432_v2  ;;  %1243 = vmatprep.subr.bf16.mxu1 (!%p217_p9), %v1350_v1  ;;  %v1354_v9 = vld [vmem:[%s1745_s2 + $0x20] sm:$0xff] (!%p217_p9)   ;;  %v1355_v12 = vld [vmem:[%s1745_s2 + $0x28] sm:$0xff] (!%p217_p9)   ;;  %v1356_v24 = vld [vmem:[%s1745_s2 + $0x30] sm:$0xff] (!%p217_p9)   ;;  %s243_s10 = sand.u32 (!%p217_p9), 1, %s1424_s22   ;;  %s1149_s12 = sshll.u32 (!%p217_p9), %s1492_s25, 6 }
  0x10   : > { %1244 = vmatpush3.bf16.msra.mxu1 (!%p217_p9), %v1350_v1  ;;  %v1357_v25 = vld [vmem:[%s1745_s2 + $0x38] sm:$0xff] (!%p217_p9)   ;;  %v1587_v26 = vld [vmem:[%s1747_s4] ss:$0 sm:$0xff] (!%p217_p9)  ;;  %s1699_s17 = scalar_lea.hbm (!%p217_p9), %s1749_s6, %s1149_s12  ;;  %s1435_s19 = smov (!%p217_p9), [#allocation2]  }
  0x11   : > { %1245 = vmatprep.subr.bf16.mxu1 (!%p217_p9), %v1351_v3  ;;  %s1374_s20 = sshll.u32 (!%p217_p9), %s1435_s19, 4  ;;  %s1375_s20 = int_to_ptr.vmem [resolvable:$false] %s1374_s20 }
  0x14   : > { %1246 = vmatpush3.bf16.msra.mxu1 (!%p217_p9), %v1351_v3 }
  0x15   : > { %s1757_s11 = smov (!%p247_p10, %s1098_s11), 127  ;;  %1247 = vmatprep.subr.bf16.mxu1 %v1352_v4 }
  0x16   : > { %s1099_s18 = sshll.u32 %s1757_s11, 2  ;;  %s1097_s11 = sshll.u32 %s243_s10, 2 }
  0x17   : > { %s1535_s26 = scalar_lea.vmem %s1743_s0, %s1099_s18  ;;  %s245_s13 = scalar_lea.vmem [#allocation2], %s1097_s11 }
  0x18   : > { %v1334_v6 = vld [vmem:[%s1535_s26] sm:$0xff]   ;;  %v1335_v7 = vld [vmem:[%s1535_s26 + $0x8] sm:$0xff]   ;;  %v1336_v8 = vld [vmem:[%s1535_s26 + $0x10] sm:$0xff]   ;;  %1248 = vmatpush3.bf16.msra.mxu1 %v1352_v4  ;;  %s1034_s14 = sshll.u32 %s245_s13, 4  ;;  %s1020_s18 = scalar_lea.sflag [#allocation3], %s243_s10  ;;  %s1701_s14 = int_to_ptr.vmem [resolvable:$true] %s1034_s14 }
  0x19   : > { %1211 = vmatprep.mubr.msk.bf16.mxu0 %vm381_vm1, %v1334_v6  ;;  %1249 = vmatprep.subr.bf16.mxu1 %v1353_v5  ;;  %v1337_v10 = vld [vmem:[%s1535_s26 + $0x18] sm:$0xff]   ;;  %v1338_v11 = vld [vmem:[%s1535_s26 + $0x20] sm:$0xff]   ;;  %v1339_v13 = vld [vmem:[%s1535_s26 + $0x28] sm:$0xff]   ;;  %s1370_s25 = scalar_lea.vmem %s1701_s14, 64  ;;  %p1377_p0 = scmp.lt.s32.totalorder %s1701_s14, %s1375_s20 }
  0x1a   : > { %1212 = vmatmul.mubr.msk.bf16.vlgmr.msra.gmra.mrb[0].mxu0 %vm381_vm1, %v1335_v7  ;;  %v1340_v14 = vld [vmem:[%s1535_s26 + $0x30] sm:$0xff]   ;;  %v1341_v15 = vld [vmem:[%s1535_s26 + $0x38] sm:$0xff]   ;;  %v1342_v16 = vld [vmem:[%s1535_s26 + $0x40] sm:$0xff]   ;;  %p1371_p11 = scmp.ne.s32.totalorder %s1701_s14, %s1370_s25 }
  0x1b   : > { %1215 = vmatprep.mubr.msk.bf16.mxu0 %vm381_vm1, %v1336_v8  ;;  %v1343_v17 = vld [vmem:[%s1535_s26 + $0x48] sm:$0xff]   ;;  %v1344_v18 = vld [vmem:[%s1535_s26 + $0x50] sm:$0xff]   ;;  %v1345_v19 = vld [vmem:[%s1535_s26 + $0x58] sm:$0xff]  }
  0x1c   : > { %1250 = vmatpush3.bf16.msra.mxu1 %v1353_v5  ;;  %v1346_v20 = vld [vmem:[%s1535_s26 + $0x60] sm:$0xff]   ;;  %v1347_v21 = vld [vmem:[%s1535_s26 + $0x68] sm:$0xff]   ;;  %v1348_v22 = vld [vmem:[%s1535_s26 + $0x70] sm:$0xff]   ;;  %p1372_p12 = pnand %p1371_p11, %p1509_p5 }
  0x1d   : > { %1251 = vmatprep.subr.bf16.mxu1 %v1354_v9  ;;  %v1349_v23 = vld [vmem:[%s1535_s26 + $0x78] sm:$0xff]   ;;  %s1376_s26 = scalar_lea.vmem %s1375_s20, 128 }
  0x1e   : > { %p1373_p13 = pneg %p1372_p12  ;;  %p1378_p1 = scmp.lt.s32.totalorder %s1376_s26, %s1370_s25 }
  0x20   : > { %1252 = vmatpush3.bf16.msra.mxu1 %v1354_v9  ;;  %p1379_p2 = por %p1378_p1, %p1377_p0 }
  0x21   : > { %1253 = vmatprep.subr.bf16.mxu1 %v1355_v12 }
  0x22   : > { %1216 = vmatmul.mubr.msk.bf16.gmra.mrb[4].mxu0 %vm381_vm1, %v1337_v10  ;;  %p1380_p3 = pnand %p1379_p2, %p1373_p13 }
  0x23   : > { %1219 = vmatprep.mubr.msk.bf16.mxu0 %vm381_vm1, %v1338_v11 }
  0x24   : > { %1254 = vmatpush3.bf16.msra.mxu1 %v1355_v12 }
  0x25   : > { %1255 = vmatprep.subr.bf16.mxu1 %v1356_v24 }
  0x28   : > { %1256 = vmatpush3.bf16.msra.mxu1 %v1356_v24 }
  0x29   : > { %1257 = vmatprep.subr.bf16.mxu1 %v1357_v25 }
  0x2a   : > { %1220 = vmatmul.mubr.msk.bf16.gmra.mrb[8].mxu0 %vm381_vm1, %v1339_v13 }
  0x2b   : > { %1223 = vmatprep.mubr.msk.bf16.mxu0 %vm381_vm1, %v1340_v14 }
  0x2c   : > { %1258 = vmatpush3.bf16.msra.mxu1 %v1357_v25 }
  0x32   : > { %1224 = vmatmul.mubr.msk.bf16.gmra.mrb[12].mxu0 %vm381_vm1, %v1341_v15 }
  0x33   : > { %1227 = vmatprep.mubr.msk.bf16.mxu0 %vm381_vm1, %v1342_v16 }
  0x3a   : > { %1228 = vmatmul.mubr.msk.bf16.gmra.mrb[16].mxu0 %vm381_vm1, %v1343_v17 }
  0x3b   : > { %1231 = vmatprep.mubr.msk.bf16.mxu0 %vm381_vm1, %v1344_v18 }
  0x42   : > { %1232 = vmatmul.mubr.msk.bf16.gmra.mrb[20].mxu0 %vm381_vm1, %v1345_v19 }
  0x43   : > { %1235 = vmatprep.mubr.msk.bf16.mxu0 %vm381_vm1, %v1346_v20 }
  0x4a   : > { %1236 = vmatmul.mubr.msk.bf16.gmra.mrb[24].mxu0 %vm381_vm1, %v1347_v21 }
  0x4b   : > { %1239 = vmatprep.mubr.msk.bf16.mxu0 %vm381_vm1, %v1348_v22 }
  0x52   : > { %1240 = vmatmul.mubr.msk.bf16.gmra.mrb[28].mxu0 %vm381_vm1, %v1349_v23 }
  0xed   : > { %v1213_v27 = vpop.f32.mrb[0].mxu0 }
  0xee   : > { %v477_v28 = vadd.f32 %v1213_v27, %v1587_v26  ;;  %v468_v29 = vpop.f32.mrb[1].mxu0 }
  0xef   : > { %v469_v30 = vadd.f32 %v1587_v26, %v468_v29  ;;  %v1214_v31 = vpop.f32.mrb[2].mxu0 }
  0xf0   : > { %v480_v32 = vadd.f32 %v1214_v31, %v1587_v26  ;;  %v471_v33 = vpop.f32.mrb[3].mxu0  ;;  %v597_v35 = vmax.f32 %v477_v28, 0.0 }
  0xf1   : > { %v472_v34 = vadd.f32 %v1587_v26, %v471_v33  ;;  %v595_v37 = vmax.f32 %v469_v30, 0.0 }
  0xf2   : > { %v598_v36 = vmax.f32 %v480_v32, 0.0 }
  0xf3   : > { %v596_v38 = vmax.f32 %v472_v34, 0.0 }
  0xf4   : > { %v628_v39 = vpack.c.bf16 %v598_v36, %v597_v35 }
  0xf5   : > { %v1217_v40 = vpop.f32.mrb[4].mxu0  ;;  %v627_v41 = vpack.c.bf16 %v596_v38, %v595_v37 }
  0xf6   : > { %v493_v42 = vadd.f32 %v1217_v40, %v1587_v26  ;;  %v484_v43 = vpop.f32.mrb[5].mxu0 }
  0xf7   : > { %v485_v44 = vadd.f32 %v1587_v26, %v484_v43  ;;  %v1218_v45 = vpop.f32.mrb[6].mxu0  ;;  %1259 = vmatprep.mubr.bf16.mxu1 %v627_v41 }
  0xf8   : > { %v496_v46 = vadd.f32 %v1218_v45, %v1587_v26  ;;  %v487_v47 = vpop.f32.mrb[7].mxu0  ;;  %1260 = vmatmul.mubr.bf16.vlgmr.msra.gmra.mrb[0].mxu1 %v628_v39  ;;  %v601_v49 = vmax.f32 %v493_v42, 0.0 }
  0xf9   : > { %v488_v48 = vadd.f32 %v1587_v26, %v487_v47  ;;  %v599_v51 = vmax.f32 %v485_v44, 0.0 }
  0xfa   : > { %v602_v50 = vmax.f32 %v496_v46, 0.0 }
  0xfb   : > { %v600_v52 = vmax.f32 %v488_v48, 0.0 }
  0xfc   : > { %v630_v53 = vpack.c.bf16 %v602_v50, %v601_v49 }
  0xfd   : > { %v629_v54 = vpack.c.bf16 %v600_v52, %v599_v51  ;;  %v1221_v55 = vpop.f32.mrb[8].mxu0 }
  0xfe   : > { %v509_v56 = vadd.f32 %v1221_v55, %v1587_v26  ;;  %v500_v57 = vpop.f32.mrb[9].mxu0 }
  0xff   : > { %v501_v58 = vadd.f32 %v1587_v26, %v500_v57  ;;  %v1222_v59 = vpop.f32.mrb[10].mxu0  ;;  %1263 = vmatprep.mubr.bf16.mxu1 %v629_v54 }
 0x100   : > { %v512_v60 = vadd.f32 %v1222_v59, %v1587_v26  ;;  %v503_v61 = vpop.f32.mrb[11].mxu0  ;;  %1264 = vmatmul.mubr.bf16.gmra.mrb[4].mxu1 %v630_v53  ;;  %v605_v63 = vmax.f32 %v509_v56, 0.0 }
 0x101   : > { %v504_v62 = vadd.f32 %v1587_v26, %v503_v61  ;;  %v603_v1 = vmax.f32 %v501_v58, 0.0 }
 0x102   : > { %v606_v0 = vmax.f32 %v512_v60, 0.0 }
 0x103   : > { %v604_v2 = vmax.f32 %v504_v62, 0.0 }
 0x104   : > { %v632_v3 = vpack.c.bf16 %v606_v0, %v605_v63 }
 0x105   : > { %v631_v4 = vpack.c.bf16 %v604_v2, %v603_v1  ;;  %v1225_v5 = vpop.f32.mrb[12].mxu0 }
 0x106   : > { %v525_v6 = vadd.f32 %v1225_v5, %v1587_v26  ;;  %v516_v7 = vpop.f32.mrb[13].mxu0 }
 0x107   : > { %v517_v8 = vadd.f32 %v1587_v26, %v516_v7  ;;  %v1226_v9 = vpop.f32.mrb[14].mxu0  ;;  %1267 = vmatprep.mubr.bf16.mxu1 %v631_v4 }
 0x108   : > { %v528_v10 = vadd.f32 %v1226_v9, %v1587_v26  ;;  %v519_v11 = vpop.f32.mrb[15].mxu0  ;;  %1268 = vmatmul.mubr.bf16.gmra.mrb[8].mxu1 %v632_v3  ;;  %v609_v13 = vmax.f32 %v525_v6, 0.0 }
 0x109   : > { %v520_v12 = vadd.f32 %v1587_v26, %v519_v11  ;;  %v607_v15 = vmax.f32 %v517_v8, 0.0 }
 0x10a   : > { %v610_v14 = vmax.f32 %v528_v10, 0.0 }
 0x10b   : > { %v608_v16 = vmax.f32 %v520_v12, 0.0  ;;  %v1624_v12 = vld [vmem:[%s1746_s3] sm:$0x1] }
 0x10c   : > { %v634_v17 = vpack.c.bf16 %v610_v14, %v609_v13  ;;  %1207 = vmatprep.mubr.bf16.mxu0 %v1624_v12  ;;  %v923_v13 = vld [vmem:[%s1748_s5] sm:$0x3]  ;;  %v1434_v14 = vmov 0  }
 0x10d   : > { %v633_v18 = vpack.c.bf16 %v608_v16, %v607_v15  ;;  %v1229_v19 = vpop.f32.mrb[16].mxu0  ;;  %1332 = vset.pattern.permute.xlu0 %v1434_v14 }
 0x10e   : > { %v541_v20 = vadd.f32 %v1229_v19, %v1587_v26  ;;  %v532_v21 = vpop.f32.mrb[17].mxu0  ;;  %926 = vperm.xlu0 %1332, %v923_v13  }
 0x10f   : > { %v533_v22 = vadd.f32 %v1587_v26, %v532_v21  ;;  %v1230_v23 = vpop.f32.mrb[18].mxu0  ;;  %1271 = vmatprep.mubr.bf16.mxu1 %v633_v18 }
 0x110   : > { %v544_v24 = vadd.f32 %v1230_v23, %v1587_v26  ;;  %v535_v25 = vpop.f32.mrb[19].mxu0  ;;  %1272 = vmatmul.mubr.bf16.gmra.mrb[12].mxu1 %v634_v17  ;;  %v613_v28 = vmax.f32 %v541_v20, 0.0 }
 0x111   : > { %v536_v27 = vadd.f32 %v1587_v26, %v535_v25  ;;  %v611_v30 = vmax.f32 %v533_v22, 0.0 }
 0x112   : > { %v614_v29 = vmax.f32 %v544_v24, 0.0 }
 0x113   : > { %v612_v31 = vmax.f32 %v536_v27, 0.0 }
 0x114   : > { %v636_v32 = vpack.c.bf16 %v614_v29, %v613_v28 }
 0x115   : > { %v635_v33 = vpack.c.bf16 %v612_v31, %v611_v30  ;;  %v1233_v34 = vpop.f32.mrb[20].mxu0 }
 0x116   : > { %v557_v35 = vadd.f32 %v1233_v34, %v1587_v26  ;;  %v548_v36 = vpop.f32.mrb[21].mxu0 }
 0x117   : > { %v549_v37 = vadd.f32 %v1587_v26, %v548_v36  ;;  %1275 = vmatprep.mubr.bf16.mxu1 %v635_v33  ;;  %v1234_v38 = vpop.f32.mrb[22].mxu0 }
 0x118   : > { %v617_v39 = vmax.f32 %v557_v35, 0.0  ;;  %v560_v40 = vadd.f32 %v1234_v38, %v1587_v26  ;;  %1276 = vmatmul.mubr.bf16.gmra.mrb[16].mxu1 %v636_v32  ;;  %v551_v41 = vpop.f32.mrb[23].mxu0 }
 0x119   : > { %v615_v42 = vmax.f32 %v549_v37, 0.0  ;;  %v552_v43 = vadd.f32 %v1587_v26, %v551_v41 }
 0x11a   : > { %v618_v44 = vmax.f32 %v560_v40, 0.0 }
 0x11b   : > { %v616_v45 = vmax.f32 %v552_v43, 0.0 }
 0x11c   : > { %v638_v46 = vpack.c.bf16 %v618_v44, %v617_v39 }
 0x11d   : > { %v637_v47 = vpack.c.bf16 %v616_v45, %v615_v42  ;;  %v1237_v48 = vpop.f32.mrb[24].mxu0 }
 0x11e   : > { %v573_v49 = vadd.f32 %v1237_v48, %v1587_v26  ;;  %v564_v50 = vpop.f32.mrb[25].mxu0 }
 0x11f   : > { %1279 = vmatprep.mubr.bf16.mxu1 %v637_v47  ;;  %v565_v51 = vadd.f32 %v1587_v26, %v564_v50  ;;  %v1238_v52 = vpop.f32.mrb[26].mxu0 }
 0x120   : > { %1280 = vmatmul.mubr.bf16.gmra.mrb[20].mxu1 %v638_v46  ;;  %v621_v53 = vmax.f32 %v573_v49, 0.0  ;;  %v576_v54 = vadd.f32 %v1238_v52, %v1587_v26  ;;  %v567_v55 = vpop.f32.mrb[27].mxu0 }
 0x121   : > { %v619_v56 = vmax.f32 %v565_v51, 0.0  ;;  %v568_v57 = vadd.f32 %v1587_v26, %v567_v55 }
 0x122   : > { %v622_v58 = vmax.f32 %v576_v54, 0.0 }
 0x123   : > { %v620_v59 = vmax.f32 %v568_v57, 0.0 }
 0x124   : > { %v640_v60 = vpack.c.bf16 %v622_v58, %v621_v53 }
 0x125   : > { %v639_v61 = vpack.c.bf16 %v620_v59, %v619_v56  ;;  %v1241_v62 = vpop.f32.mrb[28].mxu0 }
 0x126   : > { %v589_v63 = vadd.f32 %v1241_v62, %v1587_v26  ;;  %v580_v0 = vpop.f32.mrb[29].mxu0 }
 0x127   : > { %1283 = vmatprep.mubr.bf16.mxu1 %v639_v61  ;;  %v581_v1 = vadd.f32 %v1587_v26, %v580_v0  ;;  %v1242_v2 = vpop.f32.mrb[30].mxu0 }
 0x128   : > { %1284 = vmatmul.mubr.bf16.gmra.mrb[24].mxu1 %v640_v60  ;;  %v625_v3 = vmax.f32 %v589_v63, 0.0  ;;  %v592_v4 = vadd.f32 %v1242_v2, %v1587_v26  ;;  %v583_v5 = vpop.f32.mrb[31].mxu0 }
 0x129   : > { %v623_v6 = vmax.f32 %v581_v1, 0.0  ;;  %v584_v7 = vadd.f32 %v1587_v26, %v583_v5  ;;  %v1633_v26 = vld [vmem:[%s1747_s4 + $0x1] ss:$0 sm:$0xff] }
 0x12a   : > { %v626_v8 = vmax.f32 %v592_v4, 0.0 }
 0x12b   : > { %v624_v9 = vmax.f32 %v584_v7, 0.0 }
 0x12c   : > { %v642_v10 = vpack.c.bf16 %v626_v8, %v625_v3 }
 0x12d   : > { %v641_v11 = vpack.c.bf16 %v624_v9, %v623_v6 }
 0x12f   : > { %1287 = vmatprep.mubr.bf16.mxu1 %v641_v11 }
 0x130   : > { %1288 = vmatmul.mubr.bf16.gmra.mrb[28].mxu1 %v642_v10 }
 0x1cb   : > { %v1261_v15 = vpop.f32.mrb[0].mxu1 }
 0x1cc   : > { %v756_v16 = vadd.f32 %v1261_v15, %v1633_v26  ;;  %v747_v17 = vpop.f32.mrb[1].mxu1 }
 0x1cd   : > { %v748_v18 = vadd.f32 %v1633_v26, %v747_v17  ;;  %v1262_v19 = vpop.f32.mrb[2].mxu1 }
 0x1ce   : > { %v759_v20 = vadd.f32 %v1262_v19, %v1633_v26  ;;  %v750_v21 = vpop.f32.mrb[3].mxu1  ;;  %v876_v23 = vmax.f32 %v756_v16, 0.0 }
 0x1cf   : > { %v751_v22 = vadd.f32 %v1633_v26, %v750_v21  ;;  %v874_v25 = vmax.f32 %v748_v18, 0.0 }
 0x1d0   : > { %v877_v24 = vmax.f32 %v759_v20, 0.0 }
 0x1d1   : > { %v875_v27 = vmax.f32 %v751_v22, 0.0 }
 0x1d2   : > { %v1639_v28 = vpack.c.bf16 %v877_v24, %v876_v23 }
 0x1d3   : > { %v1641_v29 = vpack.c.bf16 %v875_v27, %v874_v25  ;;  %v1265_v30 = vpop.f32.mrb[4].mxu1 }
 0x1d4   : > { %v772_v31 = vadd.f32 %v1265_v30, %v1633_v26  ;;  %v763_v32 = vpop.f32.mrb[5].mxu1 }
 0x1d5   : > { %v764_v33 = vadd.f32 %v1633_v26, %v763_v32  ;;  %v1266_v34 = vpop.f32.mrb[6].mxu1 }
 0x1d6   : > { %v775_v35 = vadd.f32 %v1266_v34, %v1633_v26  ;;  %v766_v36 = vpop.f32.mrb[7].mxu1  ;;  %v880_v38 = vmax.f32 %v772_v31, 0.0 }
 0x1d7   : > { %v767_v37 = vadd.f32 %v1633_v26, %v766_v36  ;;  %v878_v40 = vmax.f32 %v764_v33, 0.0 }
 0x1d8   : > { %v881_v39 = vmax.f32 %v775_v35, 0.0 }
 0x1d9   : > { %v879_v41 = vmax.f32 %v767_v37, 0.0 }
 0x1da   : > { %v1647_v42 = vpack.c.bf16 %v881_v39, %v880_v38 }
 0x1db   : > { %v1649_v43 = vpack.c.bf16 %v879_v41, %v878_v40  ;;  %v1269_v44 = vpop.f32.mrb[8].mxu1 }
 0x1dc   : > { %v788_v45 = vadd.f32 %v1269_v44, %v1633_v26  ;;  %v779_v46 = vpop.f32.mrb[9].mxu1 }
 0x1dd   : > { %v780_v47 = vadd.f32 %v1633_v26, %v779_v46  ;;  %v1270_v48 = vpop.f32.mrb[10].mxu1 }
 0x1de   : > { %v791_v49 = vadd.f32 %v1270_v48, %v1633_v26  ;;  %v782_v50 = vpop.f32.mrb[11].mxu1  ;;  %v884_v52 = vmax.f32 %v788_v45, 0.0 }
 0x1df   : > { %v783_v51 = vadd.f32 %v1633_v26, %v782_v50  ;;  %v882_v54 = vmax.f32 %v780_v47, 0.0 }
 0x1e0   : > { %v885_v53 = vmax.f32 %v791_v49, 0.0 }
 0x1e1   : > { %v883_v55 = vmax.f32 %v783_v51, 0.0 }
 0x1e2   : > { %v1655_v56 = vpack.c.bf16 %v885_v53, %v884_v52 }
 0x1e3   : > { %v1657_v57 = vpack.c.bf16 %v883_v55, %v882_v54  ;;  %v1273_v58 = vpop.f32.mrb[12].mxu1 }
 0x1e4   : > { %v804_v59 = vadd.f32 %v1273_v58, %v1633_v26  ;;  %v795_v60 = vpop.f32.mrb[13].mxu1 }
 0x1e5   : > { %v796_v61 = vadd.f32 %v1633_v26, %v795_v60  ;;  %v1274_v62 = vpop.f32.mrb[14].mxu1 }
 0x1e6   : > { %v807_v63 = vadd.f32 %v1274_v62, %v1633_v26  ;;  %v798_v0 = vpop.f32.mrb[15].mxu1  ;;  %v888_v2 = vmax.f32 %v804_v59, 0.0 }
 0x1e7   : > { %v799_v1 = vadd.f32 %v1633_v26, %v798_v0  ;;  %v886_v4 = vmax.f32 %v796_v61, 0.0 }
 0x1e8   : > { %v889_v3 = vmax.f32 %v807_v63, 0.0 }
 0x1e9   : > { %v887_v5 = vmax.f32 %v799_v1, 0.0 }
 0x1ea   : > { %v1663_v6 = vpack.c.bf16 %v889_v3, %v888_v2 }
 0x1eb   : > { %v1665_v7 = vpack.c.bf16 %v887_v5, %v886_v4  ;;  %v1277_v8 = vpop.f32.mrb[16].mxu1 }
 0x1ec   : > { %v820_v9 = vadd.f32 %v1277_v8, %v1633_v26  ;;  %v811_v10 = vpop.f32.mrb[17].mxu1 }
 0x1ed   : > { %v812_v11 = vadd.f32 %v1633_v26, %v811_v10  ;;  %v1278_v13 = vpop.f32.mrb[18].mxu1 }
 0x1ee   : > { %v823_v14 = vadd.f32 %v1278_v13, %v1633_v26  ;;  %v814_v15 = vpop.f32.mrb[19].mxu1  ;;  %v892_v17 = vmax.f32 %v820_v9, 0.0 }
 0x1ef   : > { %v815_v16 = vadd.f32 %v1633_v26, %v814_v15  ;;  %v890_v19 = vmax.f32 %v812_v11, 0.0 }
 0x1f0   : > { %v893_v18 = vmax.f32 %v823_v14, 0.0 }
 0x1f1   : > { %v891_v20 = vmax.f32 %v815_v16, 0.0 }
 0x1f2   : > { %v916_v21 = vpack.c.bf16 %v893_v18, %v892_v17 }
 0x1f3   : > { %v915_v22 = vpack.c.bf16 %v891_v20, %v890_v19  ;;  %v1281_v23 = vpop.f32.mrb[20].mxu1  ;;  %v1002_v20 = vlaneseq }
 0x1f4   : > { %v836_v24 = vadd.f32 %v1281_v23, %v1633_v26  ;;  %v827_v25 = vpop.f32.mrb[21].mxu1 }
 0x1f5   : > { %v828_v27 = vadd.f32 %v1633_v26, %v827_v25  ;;  %1191 = vmatprep.subr.bf16.mxu0 %v915_v22  ;;  %v1282_v30 = vpop.f32.mrb[22].mxu1  ;;  %v1003_v25 = vshrl.u32 %v1002_v20, 7 }
 0x1f6   : > { %v896_v31 = vmax.f32 %v836_v24, 0.0  ;;  %v839_v32 = vadd.f32 %v1282_v30, %v1633_v26  ;;  %1192 = vmatpush3.bf16.xpose.msra.mxu0 %v1641_v29  ;;  %v830_v33 = vpop.f32.mrb[23].mxu1 }
 0x1f7   : > { %v894_v34 = vmax.f32 %v828_v27, 0.0  ;;  %v831_v35 = vadd.f32 %v1633_v26, %v830_v33  ;;  %1193 = vmatprep.subr.bf16.mxu0 %v916_v21  ;;  %vm1004_vm4 = vcmp.eq.s32.totalorder %v1003_v25, 0 }
 0x1f8   : > { %v897_v36 = vmax.f32 %v839_v32, 0.0 }
 0x1f9   : > { %v895_v37 = vmax.f32 %v831_v35, 0.0 }
 0x1fa   : > { %v918_v38 = vpack.c.bf16 %v897_v36, %v896_v31 }
 0x1fb   : > { %v917_v39 = vpack.c.bf16 %v895_v37, %v894_v34  ;;  %v1285_v40 = vpop.f32.mrb[24].mxu1 }
 0x1fc   : > { %v852_v41 = vadd.f32 %v1285_v40, %v1633_v26  ;;  %v843_v44 = vpop.f32.mrb[25].mxu1 }
 0x1fd   : > { %v844_v45 = vadd.f32 %v1633_v26, %v843_v44  ;;  %v1286_v46 = vpop.f32.mrb[26].mxu1 }
 0x1fe   : > { %1194 = vmatpush3.bf16.xpose.msra.mxu0 %v1639_v28  ;;  %v900_v47 = vmax.f32 %v852_v41, 0.0  ;;  %v855_v29 = vadd.f32 %v1286_v46, %v1633_v26  ;;  %v846_v48 = vpop.f32.mrb[27].mxu1 }
 0x1ff   : > { %1195 = vmatprep.subr.bf16.mxu0 %v917_v39  ;;  %v898_v49 = vmax.f32 %v844_v45, 0.0  ;;  %v847_v50 = vadd.f32 %v1633_v26, %v846_v48 }
 0x200   : > { %v901_v51 = vmax.f32 %v855_v29, 0.0 }
 0x201   : > { %v899_v52 = vmax.f32 %v847_v50, 0.0 }
 0x202   : > { %v920_v53 = vpack.c.bf16 %v901_v51, %v900_v47 }
 0x203   : > { %v919_v54 = vpack.c.bf16 %v899_v52, %v898_v49  ;;  %v1289_v55 = vpop.f32.mrb[28].mxu1 }
 0x204   : > { %v868_v58 = vadd.f32 %v1289_v55, %v1633_v26  ;;  %v859_v59 = vpop.f32.mrb[29].mxu1 }
 0x205   : > { %v860_v60 = vadd.f32 %v1633_v26, %v859_v59  ;;  %v1290_v61 = vpop.f32.mrb[30].mxu1 }
 0x206   : > { %1196 = vmatpush3.bf16.xpose.msra.mxu0 %v1649_v43  ;;  %v904_v28 = vmax.f32 %v868_v58, 0.0  ;;  %v871_v62 = vadd.f32 %v1290_v61, %v1633_v26  ;;  %v862_v63 = vpop.f32.mrb[31].mxu1 }
 0x207   : > { %1197 = vmatprep.subr.bf16.mxu0 %v918_v38  ;;  %v902_v0 = vmax.f32 %v860_v60, 0.0  ;;  %v863_v1 = vadd.f32 %v1633_v26, %v862_v63  ;;  %v927_v26 = vpop.permute.xlu0 %926 }
 0x208   : > { %v905_v2 = vmax.f32 %v871_v62, 0.0 }
 0x209   : > { %v903_v3 = vmax.f32 %v863_v1, 0.0 }
 0x20a   : > { %v922_v4 = vpack.c.bf16 %v905_v2, %v904_v28 }
 0x20b   : > { %v921_v5 = vpack.c.bf16 %v903_v3, %v902_v0 }
 0x20e   : > { %1198 = vmatpush3.bf16.xpose.msra.mxu0 %v1647_v42 }
 0x20f   : > { %1199 = vmatprep.subr.bf16.mxu0 %v919_v54 }
 0x216   : > { %1200 = vmatpush3.bf16.xpose.msra.mxu0 %v1657_v57 }
 0x217   : > { %1201 = vmatprep.subr.bf16.mxu0 %v920_v53 }
 0x21e   : > { %1202 = vmatpush3.bf16.xpose.msra.mxu0 %v1655_v56 }
 0x21f   : > { %1203 = vmatprep.subr.bf16.mxu0 %v921_v5 }
 0x226   : > { %1204 = vmatpush3.bf16.xpose.msra.mxu0 %v1665_v7 }
 0x227   : > { %1205 = vmatprep.subr.bf16.mxu0 %v922_v4 }
 0x22e   : > { %1206 = vmatpush3.bf16.xpose.msra.mxu0 %v1663_v6 }
 0x235   : > { %1208 = vmatmul.mubr.bf16.vlgmr.msra.gmra.mrb[32].mxu0 %v1624_v12 }
 0x308   : > { %v963_v43 = vpop.f32.mrb[32].mxu0 }
 0x309   : > { %v964_v8 = vadd.f32 %v963_v43, %v927_v26  ;;  %v965_v9 = vpop.f32.mrb[33].mxu0 }
 0x30a   : > { %v966_v10 = vadd.f32 %v965_v9, %v927_v26  ;;  %v967_v42 = vpop.f32.mrb[34].mxu0 }
 0x30b   : > { %v974_v11 = vand.u32 2147483647, %v964_v8  ;;  %v968_v13 = vpop.f32.mrb[35].mxu0  ;;  %v972_v33 = vmax.f32 %v964_v8, 0.0 }
 0x30c   : > { %v975_v57 = vand.u32 2147483647, %v966_v10  ;;  %v973_v37 = vmax.f32 %v966_v10, 0.0 }
 0x30d   : > { %v976_v14 = vsub.f32 0.0, %v974_v11 }
 0x30e   : > { %v977_v15 = vsub.f32 0.0, %v975_v57 }
 0x30f   : > { %v978_v56 = vmul.f32 1.442695, %v976_v14 }
 0x310   : > { %v980_v16 = vmul.f32 1.442695, %v977_v15 }
 0x311   : > { %1358 = vpow2.f32 %v978_v56 }
 0x312   : > { %1360 = vpow2.f32 %v980_v16 }
 0x31b   : > { %v1359_v7 = vpop.eup %1358 }
 0x31c   : > { %v1361_v6 = vpop.eup %1360  ;;  %v982_v12 = vadd.f32 1.0, %v1359_v7  ;;  %v985_v18 = vmul.f32 -0.5, %v1359_v7  ;;  %v988_v22 = vand.u32 2147483647, %v1359_v7 }
 0x31d   : > { %v991_v17 = vadd.f32 1.0, %v1361_v6  ;;  %v994_v19 = vmul.f32 -0.5, %v1361_v6  ;;  %v997_v24 = vand.u32 2147483647, %v1361_v6 }
 0x31e   : > { %1362 = vlog2.f32 %v982_v12  ;;  %v986_v21 = vadd.f32 1.0, %v985_v18  ;;  %vm989_vm2 = vcmp.lt.f32.partialorder %v988_v22, 0.0004427343 }
 0x31f   : > { %1364 = vlog2.f32 %v991_v17  ;;  %v995_v23 = vadd.f32 1.0, %v994_v19  ;;  %vm998_vm3 = vcmp.lt.f32.partialorder %v997_v24, 0.0004427343 }
 0x320   : > { %1366 = vtanh.f32 %v964_v8  ;;  %v987_v32 = vmul.f32 %v1359_v7, %v986_v21 }
 0x321   : > { %1368 = vtanh.f32 %v966_v10  ;;  %v996_v35 = vmul.f32 %v1361_v6, %v995_v23 }
 0x328   : > { %v1363_v27 = vpop.eup %1362 }
 0x329   : > { %v1365_v30 = vpop.eup %1364  ;;  %v984_v31 = vmul.f32 0.6931472, %v1363_v27 }
 0x32a   : > { %v993_v34 = vmul.f32 0.6931472, %v1365_v30  ;;  %v1367_v40 = vpop.eup %1366 }
 0x32b   : > { %v990_v36 = vsel %vm989_vm2, %v987_v32, %v984_v31  ;;  %v1369_v44 = vpop.eup %1368 }
 0x32c   : > { %v1000_v38 = vadd.f32 %v990_v36, %v972_v33  ;;  %v999_v39 = vsel %vm998_vm3, %v996_v35, %v993_v34 }
 0x32d   : > { %v1001_v41 = vadd.f32 %v999_v39, %v973_v37 }
 0x32e   : > { %v1005_v45 = vsel %vm1004_vm4, %v1367_v40, %v1000_v38 }
 0x32f   : > { %v1006_v46 = vsel %vm1004_vm4, %v1369_v44, %v1001_v41 }
 0x330   : > { %v1009_v47 = vcombine.low %v1005_v45, %v1006_v46 }
 0x332   : > { %1143 = vst.sshfl [vmem:[%s245_s13] sm:$0x33 pattern:$0x76325410] %v1009_v47 }
 0x333   : > { %1383 = shalt.err (!%p1380_p3)
}
 0x334   : > { %s1384_s28 = scalar_lea.hbm %s1699_s17, 64  ;;  %s1388_s10 = scalar_lea.hbm %s1749_s6, 256 }
 0x335   : > { %p1385_p4 = scmp.ne.s32.totalorder %s1699_s17, %s1384_s28  ;;  %p1389_p9 = scmp.lt.u32.totalorder %s1699_s17, %s1749_s6 }
 0x336   : > { %p1390_p10 = scmp.lt.u32.totalorder %s1388_s10, %s1384_s28  ;;  %p1392_p12 = scmp.lt.u32.totalorder %s1384_s28, %s1699_s17 }
 0x337   : > { %p1386_p7 = pnand %p1385_p4, %p1509_p5 }
 0x338   : > { %p1391_p11 = por %p1390_p10, %p1389_p9 }
 0x339   : > { %p1387_p8 = pneg %p1386_p7 }
 0x33a   : > { %p1393_p13 = por %p1392_p12, %p1391_p11 }
 0x33c   : > { %p1394_p0 = pnand %p1393_p13, %p1387_p8 }
 0x33e   : > { %1397 = shalt.err (!%p1394_p0)
}
 0x33f   : > { %1292 = dma.vmem_to_hbm [thread:$0]  (%p1509_p5), %s1701_s14, 64, %s1699_s17, %s1020_s18  }
 0x340 PF: > { %p1298_p1 = scmp.ge.s32.totalorder %s1432_s24, 2  ;;  %s1046_s13 = sand.u32 1, %s1420_s21  }
 0x341   : > { %s1047_s15 = scalar_lea.sflag [#allocation3], %s1046_s13 }
 0x342   : > { %p1295_p2 = pnand %p1298_p1, %p1513_p6 }
 0x344   : > { %1415 = dma.done.wait (!%p1295_p2), %s1047_s15, 64  }
 0x345   : > { %1417 = vsyncadd (!%p1295_p2), %s1047_s15, 4294967232  ;;  %p16_p3 = scmp.ge.s32.totalorder %s1496_s27, 6   ;;  %s1752_s21 = smov %s1424_s22 }
 0x346   : > { %s1753_s22 = smov %s1428_s23  ;;  %s1754_s23 = smov %s1507_s30 }
 0x347   : > { %s1755_s24 = smov %s1496_s27  ;;  %18 = sbr.rel (!%p16_p3) target bundleno = 3 (0x3), region = 79 }
 0x34e   :  { %1052 = vsyncpa [#allocation3], 1 }
 0x34f   :  { %1054 = vsyncpa [#allocation3 + $0x1], 1 }

</bundles_post_ra>
